<compile_context>
chip_gen: v7x
topology: tpu7x:2x2x1
jax: 0.10.0
libtpu: 0.0.40
codegen_flags: <defaults>
</compile_context>

<pallas_src>
import functools

import jax
import jax.numpy as jnp
from jax.experimental import pallas as pl
from jax.experimental.pallas import tpu as pltpu


# bf16 halves HBM traffic for the (memory-bound) conv stack on v6e/v7x.
# TODO(synk): switch to jnp.float32 on v5e (no native bf16 VPU/EUP).
COMPUTE_DTYPE = jnp.bfloat16


# ----------------------------------------------------------------------------
# Tiling helper
# ----------------------------------------------------------------------------
def _pick_tile(n, max_tile=2048):
    """Largest multiple-of-128 tile dividing n (capped), preferring >=2 steps.

    If n is not 128-aligned we fall back to a single full-extent block
    (correct, but slower); callers should pad N to a multiple of 256.
    """
    if n % 128 != 0:
        return n
    cap = min(max_tile, n)
    cap -= cap % 128
    best = None
    t = cap
    while t >= 128:
        if n % t == 0:
            if n // t >= 2:
                return t          # >= 2 grid steps: pipelining + both v7x TCs
            if best is None:
                best = t
        t -= 128
    return best if best is not None else n


# ----------------------------------------------------------------------------
# Activation handling (applied inside the kernels, incl. fused multi-head acts)
# ----------------------------------------------------------------------------
def _apply_act(y, act):
    if act == "none":
        return y
    if act == "relu":
        return jnp.maximum(y, 0.0)
    if act == "sigmoid":
        return jax.nn.sigmoid(y)
    if act == "tanh":
        return jnp.tanh(y)
    if act == "cent_head":
        # fused centroid head: rows 0..2 = offset (tanh), row 3 = dist (sigmoid)
        rows = jax.lax.broadcasted_iota(jnp.int32, y.shape, 0)
        return jnp.where(rows < 3, jnp.tanh(y), jax.nn.sigmoid(y))
    if act == "seg_head":
        # fused seg head: rows 0,1 = pd_1; row 2 = weight_1 (sigmoid); rows 3,4 = pd_2
        rows = jax.lax.broadcasted_iota(jnp.int32, y.shape, 0)
        return jnp.where(rows == 2, jax.nn.sigmoid(y), y)
    raise ValueError(f"unknown act: {act}")


# ----------------------------------------------------------------------------
# Pallas kernels
# ----------------------------------------------------------------------------
def _conv1x1_kernel(x_ref, w_ref, b_ref, o_ref, *, act):
    # x_ref: (Cin, tn)  w_ref: (Cout, Cin)  b_ref: (Cout, 1)  o_ref: (Cout, tn)
    y = jnp.dot(w_ref[...], x_ref[...], preferred_element_type=jnp.float32)
    y = y + b_ref[...]
    o_ref[...] = _apply_act(y, act).astype(o_ref.dtype)


def conv1x1(x, w, b, act="none", max_tile=2048):
    """Point-wise 1x1 conv as a Pallas matmul.  x: (Cin, N), w: (Cout, Cin)."""
    cin, n = x.shape
    cout = w.shape[0]
    tn = _pick_tile(n, max_tile)
    b2 = b.reshape(cout, 1).astype(jnp.float32)
    return pl.pallas_call(
        functools.partial(_conv1x1_kernel, act=act),
        out_shape=jax.ShapeDtypeStruct((cout, n), jnp.float32),
        grid_spec=pltpu.PrefetchScalarGridSpec(
            num_scalar_prefetch=0,
            grid=(n // tn,),
            in_specs=[
                pl.BlockSpec((cin, tn), lambda i: (0, i)),
                pl.BlockSpec((cout, cin), lambda i: (0, 0)),
                pl.BlockSpec((cout, 1), lambda i: (0, 0)),
            ],
            out_specs=pl.BlockSpec((cout, tn), lambda i: (0, i)),
        ),
        compiler_params=pltpu.CompilerParams(dimension_semantics=("parallel",)),
    )(x.astype(COMPUTE_DTYPE), w.astype(COMPUTE_DTYPE), b2)


def _conv1x1_batched_kernel(x_ref, w_ref, b_ref, o_ref, *, act):
    # x_ref: (1, Cin, tn)  w_ref: (Cout, Cin)  b_ref: (Cout, 1)  o_ref: (1, Cout, tn)
    y = jnp.dot(w_ref[...], x_ref[0], preferred_element_type=jnp.float32)
    y = y + b_ref[...]
    o_ref[0] = _apply_act(y, act).astype(o_ref.dtype)


def conv1x1_batched(x, w, b, act="none", max_tile=2048):
    """Batched 1x1 conv on (K, Cin, Np) tensors -> (K, Cout, Np).

    Runs directly on the cluster-major layout so the seg module needs no
    transpose/reshape HBM copies before/after the kernels.
    """
    k, cin, n = x.shape
    cout = w.shape[0]
    tn = _pick_tile(n, max_tile)
    b2 = b.reshape(cout, 1).astype(jnp.float32)
    return pl.pallas_call(
        functools.partial(_conv1x1_batched_kernel, act=act),
        out_shape=jax.ShapeDtypeStruct((k, cout, n), jnp.float32),
        grid_spec=pltpu.PrefetchScalarGridSpec(
            num_scalar_prefetch=0,
            grid=(k, n // tn),
            in_specs=[
                pl.BlockSpec((1, cin, tn), lambda i, j: (i, 0, j)),
                pl.BlockSpec((cout, cin), lambda i, j: (0, 0)),
                pl.BlockSpec((cout, 1), lambda i, j: (0, 0)),
            ],
            out_specs=pl.BlockSpec((1, cout, tn), lambda i, j: (i, 0, j)),
        ),
        compiler_params=pltpu.CompilerParams(
            dimension_semantics=("parallel", "parallel")),
    )(x.astype(COMPUTE_DTYPE), w.astype(COMPUTE_DTYPE), b2)


def _sqdist_kernel(c_ref, x_ref, o_ref):
    # c_ref: (K, 3)   x_ref: (3, tn)   o_ref: (K, tn)
    # Unrolled coordinates -> pure VPU FMAs (no 3D broadcast, no XLU reduce).
    c = c_ref[...]
    x = x_ref[...]
    d0 = c[:, 0:1] - x[0:1, :]
    d1 = c[:, 1:2] - x[1:2, :]
    d2 = c[:, 2:3] - x[2:3, :]
    o_ref[...] = d0 * d0 + d1 * d1 + d2 * d2


def pairwise_sqdist(centers, xyz_t, max_tile=2048):
    """centers: (K, 3), xyz_t: (3, N) -> squared distances (K, N)."""
    k = centers.shape[0]
    n = xyz_t.shape[1]
    tn = _pick_tile(n, max_tile)
    return pl.pallas_call(
        _sqdist_kernel,
        out_shape=jax.ShapeDtypeStruct((k, n), jnp.float32),
        grid_spec=pltpu.PrefetchScalarGridSpec(
            num_scalar_prefetch=0,
            grid=(n // tn,),
            in_specs=[
                pl.BlockSpec((k, 3), lambda i: (0, 0)),
                pl.BlockSpec((3, tn), lambda i: (0, i)),
            ],
            out_specs=pl.BlockSpec((k, tn), lambda i: (0, i)),
        ),
        compiler_params=pltpu.CompilerParams(dimension_semantics=("parallel",)),
    )(centers.astype(jnp.float32), xyz_t.astype(jnp.float32))


# ----------------------------------------------------------------------------
# Model configuration / deterministic parameters
# ----------------------------------------------------------------------------
C_IN = 6            # input point feature channels
C0 = 16             # l0 per-point feature channels
C3 = 32             # l3 per-point feature channels
HID = 32            # seg-module hidden channels
NUM_CLASSES = 17
NUM_CENTERS = 8     # matches `rand_indexes[:8]` in the reference
CROP_SIZE = 128     # small stand-in for 3072
DOWNSAMPLE = 8      # l0 -> l3 strided downsample


def make_params(key):
    keys = jax.random.split(key, 9)

    def w(k, cout, cin):
        return jax.random.normal(k, (cout, cin), jnp.float32) * 0.1

    return {
        "cent_w0": w(keys[0], C0, C_IN),   "cent_b0": jnp.zeros((C0,), jnp.float32),
        "cent_w3": w(keys[1], C3, C0),     "cent_b3": jnp.zeros((C3,), jnp.float32),
        "off_w":   w(keys[2], 3, C3),      "off_b":   jnp.zeros((3,), jnp.float32),
        "dist_w":  w(keys[3], 1, C3),      "dist_b":  jnp.zeros((1,), jnp.float32),
        "seg_wh":  w(keys[4], HID, 3 + C0 + 1), "seg_bh": jnp.zeros((HID,), jnp.float32),
        "pd1_w":   w(keys[5], 2, HID),     "pd1_b":   jnp.zeros((2,), jnp.float32),
        "w1_w":    w(keys[6], 1, HID),     "w1_b":    jnp.zeros((1,), jnp.float32),
        "pd2_w":   w(keys[7], 2, HID),     "pd2_b":   jnp.zeros((2,), jnp.float32),
        "id_w":    w(keys[8], NUM_CLASSES, HID), "id_b": jnp.zeros((NUM_CLASSES,), jnp.float32),
    }


# ----------------------------------------------------------------------------
# Forward pass (mirrors TSegNetModule.forward semantics)
# ----------------------------------------------------------------------------
def tsegnet_forward(params, point_features, gt_seg, run_seg_module=True):
    # point_features: (B, 6, N)   gt_seg: (B, 1, N)   (B must be 1, as in ref)
    B, C, N = point_features.shape
    assert B == 1, "reference forward flattens batch; B=1 assumed"
    x = point_features[0]                      # (6, N)
    l0_xyz = x[:3, :]                          # (3, N)

    # ---- centroid module -----------------------------------------------------
    # TODO(synk): the real get_centroid_module() (PointNet++ backbone) is not
    # provided; replaced with a deterministic 1x1-conv stack + strided
    # downsampling producing the same output signature.
    l0_points = conv1x1(x, params["cent_w0"], params["cent_b0"], act="relu")       # (C0, N)
    ds_idx = jnp.arange(0, N, DOWNSAMPLE)
    l3_xyz = l0_xyz[:, ds_idx]                                                     # (3, N3)
    l3_points = conv1x1(l0_points[:, ds_idx], params["cent_w3"], params["cent_b3"],
                        act="relu")                                                # (C3, N3)

    # Fused offset(tanh) + dist(sigmoid) head: one kernel, one read of l3_points.
    cent_head_w = jnp.concatenate([params["off_w"], params["dist_w"]], axis=0)     # (4, C3)
    cent_head_b = jnp.concatenate([params["off_b"], params["dist_b"]], axis=0)     # (4,)
    cent_head = conv1x1(l3_points, cent_head_w, cent_head_b, act="cent_head")      # (4, N3)
    offset_result = cent_head[:3]                                                  # (3, N3)
    dist_result = cent_head[3:4]                                                   # (1, N3)

    outputs = {
        "l0_points": l0_points[None], "l3_points": l3_points[None],
        "l0_xyz": l0_xyz[None], "l3_xyz": l3_xyz[None],
        "offset_result": offset_result[None], "dist_result": dist_result[None],
    }
    if not run_seg_module:
        return outputs

    # ---- centroid clustering -> center points --------------------------------
    # TODO(synk): DBSCAN clustering + np.random.permutation of cluster centers
    # is host-side / data-dependent with no Pallas equivalent; deterministically
    # pick the NUM_CENTERS moved points with the smallest predicted distance
    # (proxy for the `dist_result < 0.3` mask + cluster means).
    moved = l3_xyz + offset_result                              # (3, N3), tiny -> plain JAX
    _, center_idx = jax.lax.top_k(-dist_result[0], NUM_CENTERS)
    center_points = moved[:, center_idx].T[None]                # (1, K, 3)

    # ---- nearest-neighbour cropping + ddf -------------------------------------
    d2 = pairwise_sqdist(center_points[0], l0_xyz)              # (K, N)  Pallas
    neg_d2_top, nn_idx = jax.lax.top_k(-d2, CROP_SIZE)          # (K, crop)
    # Distances to each cluster's own center are exactly the top_k values:
    # no separate ddf kernel / distance recompute needed.
    cropped_d2 = -neg_d2_top                                    # (K, crop)
    ddf = jnp.exp(-4.0 * jnp.sqrt(cropped_d2 + 1e-12))[:, None, :]   # (K, 1, crop)

    cropped_input_ls = jnp.transpose(x[:, nn_idx], (1, 0, 2))               # (K, 6, crop)
    cropped_feature_ls = jnp.transpose(l0_points[:, nn_idx], (1, 0, 2))     # (K, C0, crop)
    cluster_gt_seg_label = jnp.transpose(gt_seg[0][:, nn_idx], (1, 0, 2))   # (K, 1, crop)

    feat = jnp.concatenate(
        [cropped_input_ls[:, :3, :], cropped_feature_ls, ddf], axis=1)      # (K, 20, crop)

    # ---- segmentation module ---------------------------------------------------
    # TODO(synk): the real get_seg_module() is not provided; replaced with
    # deterministic 1x1-conv heads matching the (pd_1, weight_1, pd_2, id_pred)
    # output signature.  Heads are fused into a single (5, HID) kernel and run
    # directly on the (K, C, Np) layout (no transpose/reshape copies).
    hidden = conv1x1_batched(feat, params["seg_wh"], params["seg_bh"], act="relu")  # (K, H, crop)

    seg_head_w = jnp.concatenate([params["pd1_w"], params["w1_w"], params["pd2_w"]], axis=0)  # (5, H)
    seg_head_b = jnp.concatenate([params["pd1_b"], params["w1_b"], params["pd2_b"]], axis=0)  # (5,)
    seg_head = conv1x1_batched(hidden, seg_head_w, seg_head_b, act="seg_head")      # (K, 5, crop)
    pd_1 = seg_head[:, 0:2]                                                          # (K, 2, crop)
    weight_1 = seg_head[:, 2:3]                                                      # (K, 1, crop)
    pd_2 = seg_head[:, 3:5]                                                          # (K, 2, crop)

    # id head: (K, HID) operand is tiny -> plain jnp (no Pallas launch for ~4k FLOPs).
    pooled = jnp.mean(hidden, axis=-1)                                               # (K, H)
    id_pred = pooled @ params["id_w"].T + params["id_b"]                             # (K, NUM_CLASSES)

    outputs.update({
        "pd_1": pd_1,
        "weight_1": weight_1,
        "pd_2": pd_2,
        "id_pred": id_pred,
        "center_points": center_points,
        "cluster_gt_seg_label": cluster_gt_seg_label,
        "cropped_feature_ls": feat,
    })
    return outputs


# ----------------------------------------------------------------------------
# Demo
# ----------------------------------------------------------------------------
if __name__ == "__main__":
    key = jax.random.PRNGKey(0)
    kp, kxyz, kfeat, kg = jax.random.split(key, 4)

    N = 1024  # small stand-in for 24000 (multiple of 256 -> lane-aligned tiles)
    params = make_params(kp)

    xyz = jax.random.uniform(kxyz, (1, 3, N), jnp.float32)
    extra = jax.random.normal(kfeat, (1, 3, N), jnp.float32) * 0.1
    point_features = jnp.concatenate([xyz, extra], axis=1)             # (1, 6, N)
    gt_seg = jax.random.randint(kg, (1, 1, N), 0, NUM_CLASSES).astype(jnp.float32)

    fwd = jax.jit(functools.partial(tsegnet_forward, params))
    outputs = fwd(point_features, gt_seg)
    jax.block_until_ready(outputs)

    # light sanity checks on shapes / values
    assert outputs["l0_points"].shape == (1, C0, N)
    assert outputs["offset_result"].shape == (1, 3, N // DOWNSAMPLE)
    assert outputs["dist_result"].shape == (1, 1, N // DOWNSAMPLE)
    assert outputs["pd_1"].shape == (NUM_CENTERS, 2, CROP_SIZE)
    assert outputs["weight_1"].shape == (NUM_CENTERS, 1, CROP_SIZE)
    assert outputs["pd_2"].shape == (NUM_CENTERS, 2, CROP_SIZE)
    assert outputs["id_pred"].shape == (NUM_CENTERS, NUM_CLASSES)
    assert outputs["cropped_feature_ls"].shape == (NUM_CENTERS, 3 + C0 + 1, CROP_SIZE)
    assert bool(jnp.isfinite(outputs["pd_1"]).all())
    assert bool(jnp.isfinite(outputs["id_pred"]).all())
    print("KERNEL_OK")
</pallas_src>

<mosaic_0001>
module attributes {stable_mosaic.version = 11 : i64} {
  func.func @_conv1x1_kernel(%arg0: i32, %arg1: memref<6x512xbf16, #tpu.memory_space<vmem>>, %arg2: memref<16x6xbf16, #tpu.memory_space<vmem>>, %arg3: memref<16x1xf32, #tpu.memory_space<vmem>>, %arg4: memref<16x512xf32, #tpu.memory_space<vmem>>) attributes {dimension_semantics = [#tpu.dimension_semantics<parallel>], iteration_bounds = array<i64: 2>, scalar_prefetch = 0 : i64, scratch_operands = 0 : i64, tpu.core_type = #tpu.core_type<tc>, window_params = [{transform_indices = @transform_0, window_bounds = array<i64: 6, 512>}, {pipeline_mode = #tpu.pipeline_mode<synchronous>, transform_indices = @transform_1, window_bounds = array<i64: 16, 6>}, {pipeline_mode = #tpu.pipeline_mode<synchronous>, transform_indices = @transform_2, window_bounds = array<i64: 16, 1>}, {transform_indices = @transform_3, window_bounds = array<i64: 16, 512>}]} {
    %c0 = arith.constant 0 : index
    %c0_0 = arith.constant 0 : index
    %0 = vector.load %arg2[%c0, %c0_0] : memref<16x6xbf16, #tpu.memory_space<vmem>>, vector<16x6xbf16>
    %c0_1 = arith.constant 0 : index
    %c0_2 = arith.constant 0 : index
    %1 = vector.load %arg1[%c0_1, %c0_2] : memref<6x512xbf16, #tpu.memory_space<vmem>>, vector<6x512xbf16>
    %cst = arith.constant dense<0.000000e+00> : vector<16x512xf32>
    %2 = tpu.matmul %0, %1, %cst {dimension_numbers = #tpu.dot_dimension_numbers<[1], [0], [0], [1], [0, 0, 1, 1], [], []>} : vector<16x6xbf16>, vector<6x512xbf16>, vector<16x512xf32> -> vector<16x512xf32>
    %c0_3 = arith.constant 0 : index
    %c0_4 = arith.constant 0 : index
    %3 = vector.load %arg3[%c0_3, %c0_4] : memref<16x1xf32, #tpu.memory_space<vmem>>, vector<16x1xf32>
    %4 = vector.broadcast %3 : vector<16x1xf32> to vector<16x512xf32>
    %5 = arith.addf %2, %4 : vector<16x512xf32>
    %cst_5 = arith.constant 0.000000e+00 : f32
    %6 = vector.broadcast %cst_5 : f32 to vector<16x512xf32>
    %7 = arith.maximumf %5, %6 : vector<16x512xf32>
    %c0_6 = arith.constant 0 : index
    %c0_7 = arith.constant 0 : index
    %8 = vector.load %arg4[%c0_6, %c0_7] : memref<16x512xf32, #tpu.memory_space<vmem>>, vector<16x512xf32>
    tpu.vector_store %arg4[%c0_6, %c0_7], %7 {strides = array<i32>} : memref<16x512xf32, #tpu.memory_space<vmem>>, vector<16x512xf32>,
    return
  }
  func.func @transform_0(%arg0: i32) -> (i32, i32) {
    %c0_i32 = arith.constant 0 : i32
    %c0_i32_0 = arith.constant 0 : i32
    return %c0_i32, %arg0 : i32, i32
  }
  func.func @transform_1(%arg0: i32) -> (i32, i32) {
    %c0_i32 = arith.constant 0 : i32
    %c0_i32_0 = arith.constant 0 : i32
    %c0_i32_1 = arith.constant 0 : i32
    return %c0_i32, %c0_i32_0 : i32, i32
  }
  func.func @transform_2(%arg0: i32) -> (i32, i32) {
    %c0_i32 = arith.constant 0 : i32
    %c0_i32_0 = arith.constant 0 : i32
    %c0_i32_1 = arith.constant 0 : i32
    return %c0_i32, %c0_i32_0 : i32, i32
  }
  func.func @transform_3(%arg0: i32) -> (i32, i32) {
    %c0_i32 = arith.constant 0 : i32
    %c0_i32_0 = arith.constant 0 : i32
    return %c0_i32, %arg0 : i32, i32
  }
}

module attributes {stable_mosaic.version = 11 : i64} {
  func.func @_conv1x1_kernel(%arg0: i32, %arg1: memref<16x128xbf16, #tpu.memory_space<vmem>>, %arg2: memref<32x16xbf16, #tpu.memory_space<vmem>>, %arg3: memref<32x1xf32, #tpu.memory_space<vmem>>, %arg4: memref<32x128xf32, #tpu.memory_space<vmem>>) attributes {dimension_semantics = [#tpu.dimension_semantics<parallel>], iteration_bounds = array<i64: 1>, scalar_prefetch = 0 : i64, scratch_operands = 0 : i64, tpu.core_type = #tpu.core_type<tc>, window_params = [{transform_indices = @transform_0, window_bounds = array<i64: 16, 128>}, {pipeline_mode = #tpu.pipeline_mode<synchronous>, transform_indices = @transform_1, window_bounds = array<i64: 32, 16>}, {pipeline_mode = #tpu.pipeline_mode<synchronous>, transform_indices = @transform_2, window_bounds = array<i64: 32, 1>}, {transform_indices = @transform_3, window_bounds = array<i64: 32, 128>}]} {
    %c0 = arith.constant 0 : index
    %c0_0 = arith.constant 0 : index
    %0 = vector.load %arg2[%c0, %c0_0] : memref<32x16xbf16, #tpu.memory_space<vmem>>, vector<32x16xbf16>
    %c0_1 = arith.constant 0 : index
    %c0_2 = arith.constant 0 : index
    %1 = vector.load %arg1[%c0_1, %c0_2] : memref<16x128xbf16, #tpu.memory_space<vmem>>, vector<16x128xbf16>
    %cst = arith.constant dense<0.000000e+00> : vector<32x128xf32>
    %2 = tpu.matmul %0, %1, %cst {dimension_numbers = #tpu.dot_dimension_numbers<[1], [0], [0], [1], [0, 0, 1, 1], [], []>} : vector<32x16xbf16>, vector<16x128xbf16>, vector<32x128xf32> -> vector<32x128xf32>
    %c0_3 = arith.constant 0 : index
    %c0_4 = arith.constant 0 : index
    %3 = vector.load %arg3[%c0_3, %c0_4] : memref<32x1xf32, #tpu.memory_space<vmem>>, vector<32x1xf32>
    %4 = vector.broadcast %3 : vector<32x1xf32> to vector<32x128xf32>
    %5 = arith.addf %2, %4 : vector<32x128xf32>
    %cst_5 = arith.constant 0.000000e+00 : f32
    %6 = vector.broadcast %cst_5 : f32 to vector<32x128xf32>
    %7 = arith.maximumf %5, %6 : vector<32x128xf32>
    %c0_6 = arith.constant 0 : index
    %c0_7 = arith.constant 0 : index
    %8 = vector.load %arg4[%c0_6, %c0_7] : memref<32x128xf32, #tpu.memory_space<vmem>>, vector<32x128xf32>
    tpu.vector_store %arg4[%c0_6, %c0_7], %7 {strides = array<i32>} : memref<32x128xf32, #tpu.memory_space<vmem>>, vector<32x128xf32>,
    return
  }
  func.func @transform_0(%arg0: i32) -> (i32, i32) {
    %c0_i32 = arith.constant 0 : i32
    %c0_i32_0 = arith.constant 0 : i32
    return %c0_i32, %arg0 : i32, i32
  }
  func.func @transform_1(%arg0: i32) -> (i32, i32) {
    %c0_i32 = arith.constant 0 : i32
    %c0_i32_0 = arith.constant 0 : i32
    %c0_i32_1 = arith.constant 0 : i32
    return %c0_i32, %c0_i32_0 : i32, i32
  }
  func.func @transform_2(%arg0: i32) -> (i32, i32) {
    %c0_i32 = arith.constant 0 : i32
    %c0_i32_0 = arith.constant 0 : i32
    %c0_i32_1 = arith.constant 0 : i32
    return %c0_i32, %c0_i32_0 : i32, i32
  }
  func.func @transform_3(%arg0: i32) -> (i32, i32) {
    %c0_i32 = arith.constant 0 : i32
    %c0_i32_0 = arith.constant 0 : i32
    return %c0_i32, %arg0 : i32, i32
  }
}

module attributes {stable_mosaic.version = 11 : i64} {
  func.func @_conv1x1_kernel(%arg0: i32, %arg1: memref<32x128xbf16, #tpu.memory_space<vmem>>, %arg2: memref<4x32xbf16, #tpu.memory_space<vmem>>, %arg3: memref<4x1xf32, #tpu.memory_space<vmem>>, %arg4: memref<4x128xf32, #tpu.memory_space<vmem>>) attributes {dimension_semantics = [#tpu.dimension_semantics<parallel>], iteration_bounds = array<i64: 1>, scalar_prefetch = 0 : i64, scratch_operands = 0 : i64, tpu.core_type = #tpu.core_type<tc>, window_params = [{transform_indices = @transform_0, window_bounds = array<i64: 32, 128>}, {pipeline_mode = #tpu.pipeline_mode<synchronous>, transform_indices = @transform_1, window_bounds = array<i64: 4, 32>}, {pipeline_mode = #tpu.pipeline_mode<synchronous>, transform_indices = @transform_2, window_bounds = array<i64: 4, 1>}, {transform_indices = @transform_3, window_bounds = array<i64: 4, 128>}]} {
    %c0 = arith.constant 0 : index
    %c0_0 = arith.constant 0 : index
    %0 = vector.load %arg2[%c0, %c0_0] : memref<4x32xbf16, #tpu.memory_space<vmem>>, vector<4x32xbf16>
    %c0_1 = arith.constant 0 : index
    %c0_2 = arith.constant 0 : index
    %1 = vector.load %arg1[%c0_1, %c0_2] : memref<32x128xbf16, #tpu.memory_space<vmem>>, vector<32x128xbf16>
    %cst = arith.constant dense<0.000000e+00> : vector<4x128xf32>
    %2 = tpu.matmul %0, %1, %cst {dimension_numbers = #tpu.dot_dimension_numbers<[1], [0], [0], [1], [0, 0, 1, 1], [], []>} : vector<4x32xbf16>, vector<32x128xbf16>, vector<4x128xf32> -> vector<4x128xf32>
    %c0_3 = arith.constant 0 : index
    %c0_4 = arith.constant 0 : index
    %3 = vector.load %arg3[%c0_3, %c0_4] : memref<4x1xf32, #tpu.memory_space<vmem>>, vector<4x1xf32>
    %4 = vector.broadcast %3 : vector<4x1xf32> to vector<4x128xf32>
    %5 = arith.addf %2, %4 : vector<4x128xf32>
    %6 = tpu.iota {dimensions = array<i32: 0>} : vector<4x128xi32>
    %c3_i32 = arith.constant 3 : i32
    %7 = vector.broadcast %c3_i32 : i32 to vector<4x128xi32>
    %8 = arith.cmpi slt, %6, %7 : vector<4x128xi32>
    %9 = math.tanh %5 : vector<4x128xf32>
    %10 = arith.negf %5 : vector<4x128xf32>
    %11 = math.exp %10 : vector<4x128xf32>
    %cst_5 = arith.constant 1.000000e+00 : f32
    %12 = vector.broadcast %cst_5 : f32 to vector<4x128xf32>
    %13 = arith.addf %12, %11 : vector<4x128xf32>
    %14 = arith.divf %12, %13 : vector<4x128xf32>
    %15 = arith.select %8, %9, %14 : vector<4x128xi1>, vector<4x128xf32>
    %c0_6 = arith.constant 0 : index
    %c0_7 = arith.constant 0 : index
    %16 = vector.load %arg4[%c0_6, %c0_7] : memref<4x128xf32, #tpu.memory_space<vmem>>, vector<4x128xf32>
    tpu.vector_store %arg4[%c0_6, %c0_7], %15 {strides = array<i32>} : memref<4x128xf32, #tpu.memory_space<vmem>>, vector<4x128xf32>,
    return
  }
  func.func @transform_0(%arg0: i32) -> (i32, i32) {
    %c0_i32 = arith.constant 0 : i32
    %c0_i32_0 = arith.constant 0 : i32
    return %c0_i32, %arg0 : i32, i32
  }
  func.func @transform_1(%arg0: i32) -> (i32, i32) {
    %c0_i32 = arith.constant 0 : i32
    %c0_i32_0 = arith.constant 0 : i32
    %c0_i32_1 = arith.constant 0 : i32
    return %c0_i32, %c0_i32_0 : i32, i32
  }
  func.func @transform_2(%arg0: i32) -> (i32, i32) {
    %c0_i32 = arith.constant 0 : i32
    %c0_i32_0 = arith.constant 0 : i32
    %c0_i32_1 = arith.constant 0 : i32
    return %c0_i32, %c0_i32_0 : i32, i32
  }
  func.func @transform_3(%arg0: i32) -> (i32, i32) {
    %c0_i32 = arith.constant 0 : i32
    %c0_i32_0 = arith.constant 0 : i32
    return %c0_i32, %arg0 : i32, i32
  }
}

module attributes {stable_mosaic.version = 11 : i64} {
  func.func @_sqdist_kernel(%arg0: i32, %arg1: memref<8x3xf32, #tpu.memory_space<vmem>>, %arg2: memref<3x512xf32, #tpu.memory_space<vmem>>, %arg3: memref<8x512xf32, #tpu.memory_space<vmem>>) attributes {dimension_semantics = [#tpu.dimension_semantics<parallel>], iteration_bounds = array<i64: 2>, scalar_prefetch = 0 : i64, scratch_operands = 0 : i64, tpu.core_type = #tpu.core_type<tc>, window_params = [{pipeline_mode = #tpu.pipeline_mode<synchronous>, transform_indices = @transform_0, window_bounds = array<i64: 8, 3>}, {transform_indices = @transform_1, window_bounds = array<i64: 3, 512>}, {transform_indices = @transform_2, window_bounds = array<i64: 8, 512>}]} {
    %c0 = arith.constant 0 : index
    %c0_0 = arith.constant 0 : index
    %0 = vector.load %arg1[%c0, %c0_0] : memref<8x3xf32, #tpu.memory_space<vmem>>, vector<8x3xf32>
    %c0_1 = arith.constant 0 : index
    %c0_2 = arith.constant 0 : index
    %1 = vector.load %arg2[%c0_1, %c0_2] : memref<3x512xf32, #tpu.memory_space<vmem>>, vector<3x512xf32>
    %2 = vector.extract_strided_slice %0 {offsets = [0, 0], sizes = [8, 1], strides = [1, 1]} : vector<8x3xf32> to vector<8x1xf32>
    %3 = vector.extract_strided_slice %1 {offsets = [0, 0], sizes = [1, 512], strides = [1, 1]} : vector<3x512xf32> to vector<1x512xf32>
    %4 = vector.broadcast %2 : vector<8x1xf32> to vector<8x512xf32>
    %5 = vector.broadcast %3 : vector<1x512xf32> to vector<8x512xf32>
    %6 = arith.subf %4, %5 : vector<8x512xf32>
    %7 = vector.extract_strided_slice %0 {offsets = [0, 1], sizes = [8, 1], strides = [1, 1]} : vector<8x3xf32> to vector<8x1xf32>
    %8 = vector.extract_strided_slice %1 {offsets = [1, 0], sizes = [1, 512], strides = [1, 1]} : vector<3x512xf32> to vector<1x512xf32>
    %9 = vector.broadcast %7 : vector<8x1xf32> to vector<8x512xf32>
    %10 = vector.broadcast %8 : vector<1x512xf32> to vector<8x512xf32>
    %11 = arith.subf %9, %10 : vector<8x512xf32>
    %12 = vector.extract_strided_slice %0 {offsets = [0, 2], sizes = [8, 1], strides = [1, 1]} : vector<8x3xf32> to vector<8x1xf32>
    %13 = vector.extract_strided_slice %1 {offsets = [2, 0], sizes = [1, 512], strides = [1, 1]} : vector<3x512xf32> to vector<1x512xf32>
    %14 = vector.broadcast %12 : vector<8x1xf32> to vector<8x512xf32>
    %15 = vector.broadcast %13 : vector<1x512xf32> to vector<8x512xf32>
    %16 = arith.subf %14, %15 : vector<8x512xf32>
    %17 = arith.mulf %6, %6 : vector<8x512xf32>
    %18 = arith.mulf %11, %11 : vector<8x512xf32>
    %19 = arith.addf %17, %18 : vector<8x512xf32>
    %20 = arith.mulf %16, %16 : vector<8x512xf32>
    %21 = arith.addf %19, %20 : vector<8x512xf32>
    %c0_3 = arith.constant 0 : index
    %c0_4 = arith.constant 0 : index
    %22 = vector.load %arg3[%c0_3, %c0_4] : memref<8x512xf32, #tpu.memory_space<vmem>>, vector<8x512xf32>
    tpu.vector_store %arg3[%c0_3, %c0_4], %21 {strides = array<i32>} : memref<8x512xf32, #tpu.memory_space<vmem>>, vector<8x512xf32>,
    return
  }
  func.func @transform_0(%arg0: i32) -> (i32, i32) {
    %c0_i32 = arith.constant 0 : i32
    %c0_i32_0 = arith.constant 0 : i32
    %c0_i32_1 = arith.constant 0 : i32
    return %c0_i32, %c0_i32_0 : i32, i32
  }
  func.func @transform_1(%arg0: i32) -> (i32, i32) {
    %c0_i32 = arith.constant 0 : i32
    %c0_i32_0 = arith.constant 0 : i32
    return %c0_i32, %arg0 : i32, i32
  }
  func.func @transform_2(%arg0: i32) -> (i32, i32) {
    %c0_i32 = arith.constant 0 : i32
    %c0_i32_0 = arith.constant 0 : i32
    return %c0_i32, %arg0 : i32, i32
  }
}

module attributes {stable_mosaic.version = 11 : i64} {
  func.func @_conv1x1_batched_kernel(%arg0: i32, %arg1: i32, %arg2: memref<1x20x128xbf16, #tpu.memory_space<vmem>>, %arg3: memref<32x20xbf16, #tpu.memory_space<vmem>>, %arg4: memref<32x1xf32, #tpu.memory_space<vmem>>, %arg5: memref<1x32x128xf32, #tpu.memory_space<vmem>>) attributes {dimension_semantics = [#tpu.dimension_semantics<parallel>, #tpu.dimension_semantics<parallel>], iteration_bounds = array<i64: 8, 1>, scalar_prefetch = 0 : i64, scratch_operands = 0 : i64, tpu.core_type = #tpu.core_type<tc>, window_params = [{transform_indices = @transform_0, window_bounds = array<i64: 1, 20, 128>}, {pipeline_mode = #tpu.pipeline_mode<synchronous>, transform_indices = @transform_1, window_bounds = array<i64: 32, 20>}, {pipeline_mode = #tpu.pipeline_mode<synchronous>, transform_indices = @transform_2, window_bounds = array<i64: 32, 1>}, {transform_indices = @transform_3, window_bounds = array<i64: 1, 32, 128>}]} {
    %c0 = arith.constant 0 : index
    %c0_0 = arith.constant 0 : index
    %0 = vector.load %arg3[%c0, %c0_0] : memref<32x20xbf16, #tpu.memory_space<vmem>>, vector<32x20xbf16>
    %c0_1 = arith.constant 0 : index
    %c0_2 = arith.constant 0 : index
    %c0_3 = arith.constant 0 : index
    %1 = vector.load %arg2[%c0_1, %c0_2, %c0_3] : memref<1x20x128xbf16, #tpu.memory_space<vmem>>, vector<1x20x128xbf16>
    %2 = vector.shape_cast %1 : vector<1x20x128xbf16> to vector<20x128xbf16>
    %cst = arith.constant dense<0.000000e+00> : vector<32x128xf32>
    %3 = tpu.matmul %0, %2, %cst {dimension_numbers = #tpu.dot_dimension_numbers<[1], [0], [0], [1], [0, 0, 1, 1], [], []>} : vector<32x20xbf16>, vector<20x128xbf16>, vector<32x128xf32> -> vector<32x128xf32>
    %c0_4 = arith.constant 0 : index
    %c0_5 = arith.constant 0 : index
    %4 = vector.load %arg4[%c0_4, %c0_5] : memref<32x1xf32, #tpu.memory_space<vmem>>, vector<32x1xf32>
    %5 = vector.broadcast %4 : vector<32x1xf32> to vector<32x128xf32>
    %6 = arith.addf %3, %5 : vector<32x128xf32>
    %cst_6 = arith.constant 0.000000e+00 : f32
    %7 = vector.broadcast %cst_6 : f32 to vector<32x128xf32>
    %8 = arith.maximumf %6, %7 : vector<32x128xf32>
    %c0_7 = arith.constant 0 : index
    %c0_8 = arith.constant 0 : index
    %c0_9 = arith.constant 0 : index
    %9 = vector.load %arg5[%c0_7, %c0_8, %c0_9] : memref<1x32x128xf32, #tpu.memory_space<vmem>>, vector<1x32x128xf32>
    %10 = vector.shape_cast %9 : vector<1x32x128xf32> to vector<32x128xf32>
    %11 = vector.shape_cast %8 : vector<32x128xf32> to vector<1x32x128xf32>
    tpu.vector_store %arg5[%c0_7, %c0_8, %c0_9], %11 {strides = array<i32>} : memref<1x32x128xf32, #tpu.memory_space<vmem>>, vector<1x32x128xf32>,
    return
  }
  func.func @transform_0(%arg0: i32, %arg1: i32) -> (i32, i32, i32) {
    %c0_i32 = arith.constant 0 : i32
    %c0_i32_0 = arith.constant 0 : i32
    return %arg0, %c0_i32, %arg1 : i32, i32, i32
  }
  func.func @transform_1(%arg0: i32, %arg1: i32) -> (i32, i32) {
    %c0_i32 = arith.constant 0 : i32
    %c0_i32_0 = arith.constant 0 : i32
    %c0_i32_1 = arith.constant 0 : i32
    return %c0_i32, %c0_i32_0 : i32, i32
  }
  func.func @transform_2(%arg0: i32, %arg1: i32) -> (i32, i32) {
    %c0_i32 = arith.constant 0 : i32
    %c0_i32_0 = arith.constant 0 : i32
    %c0_i32_1 = arith.constant 0 : i32
    return %c0_i32, %c0_i32_0 : i32, i32
  }
  func.func @transform_3(%arg0: i32, %arg1: i32) -> (i32, i32, i32) {
    %c0_i32 = arith.constant 0 : i32
    %c0_i32_0 = arith.constant 0 : i32
    return %arg0, %c0_i32, %arg1 : i32, i32, i32
  }
}

module attributes {stable_mosaic.version = 11 : i64} {
  func.func @_conv1x1_batched_kernel(%arg0: i32, %arg1: i32, %arg2: memref<1x32x128xbf16, #tpu.memory_space<vmem>>, %arg3: memref<5x32xbf16, #tpu.memory_space<vmem>>, %arg4: memref<5x1xf32, #tpu.memory_space<vmem>>, %arg5: memref<1x5x128xf32, #tpu.memory_space<vmem>>) attributes {dimension_semantics = [#tpu.dimension_semantics<parallel>, #tpu.dimension_semantics<parallel>], iteration_bounds = array<i64: 8, 1>, scalar_prefetch = 0 : i64, scratch_operands = 0 : i64, tpu.core_type = #tpu.core_type<tc>, window_params = [{transform_indices = @transform_0, window_bounds = array<i64: 1, 32, 128>}, {pipeline_mode = #tpu.pipeline_mode<synchronous>, transform_indices = @transform_1, window_bounds = array<i64: 5, 32>}, {pipeline_mode = #tpu.pipeline_mode<synchronous>, transform_indices = @transform_2, window_bounds = array<i64: 5, 1>}, {transform_indices = @transform_3, window_bounds = array<i64: 1, 5, 128>}]} {
    %c0 = arith.constant 0 : index
    %c0_0 = arith.constant 0 : index
    %0 = vector.load %arg3[%c0, %c0_0] : memref<5x32xbf16, #tpu.memory_space<vmem>>, vector<5x32xbf16>
    %c0_1 = arith.constant 0 : index
    %c0_2 = arith.constant 0 : index
    %c0_3 = arith.constant 0 : index
    %1 = vector.load %arg2[%c0_1, %c0_2, %c0_3] : memref<1x32x128xbf16, #tpu.memory_space<vmem>>, vector<1x32x128xbf16>
    %2 = vector.shape_cast %1 : vector<1x32x128xbf16> to vector<32x128xbf16>
    %cst = arith.constant dense<0.000000e+00> : vector<5x128xf32>
    %3 = tpu.matmul %0, %2, %cst {dimension_numbers = #tpu.dot_dimension_numbers<[1], [0], [0], [1], [0, 0, 1, 1], [], []>} : vector<5x32xbf16>, vector<32x128xbf16>, vector<5x128xf32> -> vector<5x128xf32>
    %c0_4 = arith.constant 0 : index
    %c0_5 = arith.constant 0 : index
    %4 = vector.load %arg4[%c0_4, %c0_5] : memref<5x1xf32, #tpu.memory_space<vmem>>, vector<5x1xf32>
    %5 = vector.broadcast %4 : vector<5x1xf32> to vector<5x128xf32>
    %6 = arith.addf %3, %5 : vector<5x128xf32>
    %7 = tpu.iota {dimensions = array<i32: 0>} : vector<5x128xi32>
    %c2_i32 = arith.constant 2 : i32
    %8 = vector.broadcast %c2_i32 : i32 to vector<5x128xi32>
    %9 = arith.cmpi eq, %7, %8 : vector<5x128xi32>
    %10 = arith.negf %6 : vector<5x128xf32>
    %11 = math.exp %10 : vector<5x128xf32>
    %cst_6 = arith.constant 1.000000e+00 : f32
    %12 = vector.broadcast %cst_6 : f32 to vector<5x128xf32>
    %13 = arith.addf %12, %11 : vector<5x128xf32>
    %14 = arith.divf %12, %13 : vector<5x128xf32>
    %15 = arith.select %9, %14, %6 : vector<5x128xi1>, vector<5x128xf32>
    %c0_7 = arith.constant 0 : index
    %c0_8 = arith.constant 0 : index
    %c0_9 = arith.constant 0 : index
    %16 = vector.load %arg5[%c0_7, %c0_8, %c0_9] : memref<1x5x128xf32, #tpu.memory_space<vmem>>, vector<1x5x128xf32>
    %17 = vector.shape_cast %16 : vector<1x5x128xf32> to vector<5x128xf32>
    %18 = vector.shape_cast %15 : vector<5x128xf32> to vector<1x5x128xf32>
    tpu.vector_store %arg5[%c0_7, %c0_8, %c0_9], %18 {strides = array<i32>} : memref<1x5x128xf32, #tpu.memory_space<vmem>>, vector<1x5x128xf32>,
    return
  }
  func.func @transform_0(%arg0: i32, %arg1: i32) -> (i32, i32, i32) {
    %c0_i32 = arith.constant 0 : i32
    %c0_i32_0 = arith.constant 0 : i32
    return %arg0, %c0_i32, %arg1 : i32, i32, i32
  }
  func.func @transform_1(%arg0: i32, %arg1: i32) -> (i32, i32) {
    %c0_i32 = arith.constant 0 : i32
    %c0_i32_0 = arith.constant 0 : i32
    %c0_i32_1 = arith.constant 0 : i32
    return %c0_i32, %c0_i32_0 : i32, i32
  }
  func.func @transform_2(%arg0: i32, %arg1: i32) -> (i32, i32) {
    %c0_i32 = arith.constant 0 : i32
    %c0_i32_0 = arith.constant 0 : i32
    %c0_i32_1 = arith.constant 0 : i32
    return %c0_i32, %c0_i32_0 : i32, i32
  }
  func.func @transform_3(%arg0: i32, %arg1: i32) -> (i32, i32, i32) {
    %c0_i32 = arith.constant 0 : i32
    %c0_i32_0 = arith.constant 0 : i32
    return %arg0, %c0_i32, %arg1 : i32, i32, i32
  }
}

</mosaic_0001>

<bundles_post_ra>
// kernel: tsegnet_forward.6
= control target key start
LH: loop header
LB: loop body
LE: loop exit
PB: predicated region body
PF: predicated region fallthrough
CT: control target
= control target key end

     0   :  { %s509_s12 = smov 0   ;;  %s511_s13 = smov 0   ;;  %s568_s0 = inlined_call_operand.vmem [shape: bf16[6,1024], index: 0, kind: input, shape index: {}]   ;;  %s569_s1 = inlined_call_operand.vmem [shape: bf16[16,6], index: 1, kind: input, shape index: {}]   ;;  %s570_s2 = inlined_call_operand.vmem [shape: f32[16,1], index: 2, kind: input, shape index: {}]   ;;  %s571_s3 = inlined_call_operand.vmem [shape: f32[16,1024], index: 3, kind: output, shape index: {}]  }
   0x1   :  { %s513_s14 = smov 0  }
   0x2 LB: > { %s522_s15 = sadd.s32 4294967295, %s486_s14   ;;  %s524_s16 = sadd.s32 1, %s486_s14   ;;  %s486_s14 = sphi %s513_s14, %s575_s14   ;;  %s482_s13 = sphi %s511_s13, %s574_s13   ;;  %s478_s12 = sphi %s509_s12, %s573_s12  }
   0x3   : > { %s85_s17 = ssub.s32 %s486_s14, %s524_s16  ;;  %s88_s18 = sadd.s32 1, %s482_s13 }
   0x4   : > { %p86_p0 = scmp.eq.s32.totalorder %s85_s17, 0  ;;  %p98_p1 = scmp.ne.s32.totalorder %s482_s13, %s478_s12 }
   0x5   : > { %p99_p2 = scmp.eq.s32.totalorder %s522_s15, 1  ;;  %p414_p3 = scmp.ge.s32.totalorder %s486_s14, 1 }
   0x6   : > { %s532_s19 = scalar_select %p86_p0, %s482_s13, %s88_s18  }
   0x7   : > { %p534_p4 = por %p99_p2, %p98_p1  ;;  %p138_p5 = scmp.lt.s32.totalorder %s486_s14, 3 }
   0x9   : > { %p139_p6 = pnand %p414_p3, %p138_p5 }
   0xa   : > { %s416_s21 = sshll.u32 (!%p139_p6), %s522_s15, 2  ;;  %v488_v0 = vmov (!%p139_p6), 0   ;;  %v173_v1 = vld [vmem:[%s570_s2] sm:$0xff] (!%p139_p6)  ;;  %v174_v2 = vld [vmem:[%s570_s2 + $0x8] sm:$0xff] (!%p139_p6)  ;;  %vm204_vm0 = vcmask (!%p139_p6), 1042432   ;;  %vm200_vm1 = vcmask (!%p139_p6), 48128  }
   0xb   : > { %142 = sbr.rel (%p139_p6) target bundleno = 256 (0x100), region = 32  ;;  %p162_p7 = scmp.lt.s32.totalorder (!%p139_p6), %s416_s21, 7  ;;  %249 = vmatprep.mubr.bf16.mxu0 (!%p139_p6), %v488_v0  ;;  %292 = vmatprep.mubr.bf16.mxu1 (!%p139_p6), %v488_v0  ;;  %v463_v11 = vld [vmem:[%s569_s1] sm:$0xff] (!%p139_p6)  }
   0xc   : > { %458 = vset.pattern.permute.xlu0 (!%p139_p6), %v488_v0  ;;  %s158_s5 = sand.u32 (!%p139_p6), 1, %s478_s12  }
   0xd   : > { %177 = vperm.xlu0 (!%p139_p6), %458, %v173_v1   ;;  %s415_s6 = sshll.u32 (!%p139_p6), %s158_s5, 6 }
   0xe   : > { %s160_s7 = scalar_lea.vmem (!%p139_p6), [#allocation2], %s415_s6 }
  0x11   : > { %182 = vperm.xlu0 (!%p139_p6), %458, %v174_v2  }
  0x12   : > { %s577_s21 = smov (!%p162_p7, %s416_s21), 7  ;;  %s432_s8 = sshll.u32 (%p534_p4), %s522_s15, 5 }
  0x13   : > { %s417_s26 = sshll.u32 %s577_s21, 2  ;;  %s328_s11 = scalar_lea.vmem (%p534_p4), %s571_s3, %s432_s8 }
  0x14   : > { %s165_s29 = scalar_lea.vmem %s568_s0, %s417_s26 }
  0x15   : > { %v171_v3 = vld [vmem:[%s165_s29] sm:$0x77]  ;;  %v172_v4 = vld [vmem:[%s165_s29 + $0x8] sm:$0x77] }
  0x16   : > { %v420_v5 = vcombine.high %v171_v3, %v171_v3  ;;  %v422_v6 = vcombine.high %v172_v4, %v172_v4  ;;  %v419_v7 = vcombine.low %v171_v3, %v171_v3  ;;  %v421_v8 = vcombine.low %v172_v4, %v172_v4 }
  0x18   : > { %423 = vmatprep.subr.msk.bf16.mxu0 %vm204_vm0, %v420_v5  ;;  %425 = vmatprep.subr.msk.bf16.mxu1 %vm204_vm0, %v422_v6  ;;  %v206_v9 = vsel %vm204_vm0, %v419_v7, 0  ;;  %v212_v10 = vsel %vm204_vm0, %v421_v8, 0 }
  0x19   : > { %218 = vmatpush1.bf16.msra.mxu0 %v206_v9  ;;  %261 = vmatpush1.bf16.msra.mxu1 %v212_v10 }
  0x1c   : > { %424 = vmatmul.mubr.msk.bf16.vlgmr.msra.gmra.mrb[0].mxu0 %vm200_vm1, %v463_v11  ;;  %426 = vmatmul.mubr.msk.bf16.vlgmr.msra.gmra.mrb[0].mxu1 %vm200_vm1, %v463_v11 }
  0x8c   : > { %v178_v12 = vpop.permute.xlu0 %177 }
  0x90   : > { %v183_v13 = vpop.permute.xlu0 %182 }
  0xef   : > { %v251_v14 = vpop.f32.mrb[0].mxu0  ;;  %v294_v15 = vpop.f32.mrb[0].mxu1 }
  0xf0   : > { %v252_v16 = vadd.f32 %v251_v14, %v178_v12  ;;  %v295_v17 = vadd.f32 %v294_v15, %v178_v12  ;;  %v253_v18 = vpop.f32.mrb[1].mxu0  ;;  %v296_v19 = vpop.f32.mrb[1].mxu1 }
  0xf1   : > { %v254_v20 = vadd.f32 %v253_v18, %v178_v12  ;;  %v297_v21 = vadd.f32 %v296_v19, %v178_v12  ;;  %v255_v22 = vpop.f32.mrb[2].mxu0  ;;  %v298_v23 = vpop.f32.mrb[2].mxu1  ;;  %325 = sbr.rel (!%p534_p4) target bundleno = 256 (0x100), region = 36 }
  0xf2   : > { %v303_v24 = vmax.f32 %v252_v16, 0.0  ;;  %v305_v25 = vmax.f32 %v295_v17, 0.0  ;;  %v256_v26 = vadd.f32 %v255_v22, %v183_v13  ;;  %v299_v27 = vadd.f32 %v298_v23, %v183_v13  ;;  %v257_v28 = vpop.f32.mrb[3].mxu0  ;;  %v300_v29 = vpop.f32.mrb[3].mxu1 }
  0xf3   : > { %v304_v30 = vmax.f32 %v254_v20, 0.0  ;;  %v306_v31 = vmax.f32 %v297_v21, 0.0  ;;  %v258_v32 = vadd.f32 %v257_v28, %v183_v13  ;;  %v301_v33 = vadd.f32 %v300_v29, %v183_v13 }
  0xf4   : > { %311 = vst [vmem:[%s160_s7] sm:$0xff] %v303_v24  ;;  %313 = vst [vmem:[%s160_s7 + $0x10] sm:$0xff] %v305_v25  ;;  %v307_v34 = vmax.f32 %v256_v26, 0.0  ;;  %v309_v35 = vmax.f32 %v299_v27, 0.0 }
  0xf5   : > { %312 = vst [vmem:[%s160_s7 + $0x8] sm:$0xff] %v304_v30  ;;  %314 = vst [vmem:[%s160_s7 + $0x18] sm:$0xff] %v306_v31  ;;  %v308_v36 = vmax.f32 %v258_v32, 0.0  ;;  %v310_v37 = vmax.f32 %v301_v33, 0.0 }
  0xf6   : > { %315 = vst [vmem:[%s160_s7 + $0x20] sm:$0xff] %v307_v34  ;;  %317 = vst [vmem:[%s160_s7 + $0x30] sm:$0xff] %v309_v35 }
  0xf7   : > { %316 = vst [vmem:[%s160_s7 + $0x28] sm:$0xff] %v308_v36  ;;  %318 = vst [vmem:[%s160_s7 + $0x38] sm:$0xff] %v310_v37 }
  0xfb   : > { %v341_v38 = vld [vmem:[%s160_s7] sm:$0xff]  ;;  %v345_v40 = vld [vmem:[%s160_s7 + $0x10] sm:$0xff] }
  0xfc   : > { %v343_v39 = vld [vmem:[%s160_s7 + $0x8] sm:$0xff]  ;;  %v347_v41 = vld [vmem:[%s160_s7 + $0x18] sm:$0xff]  ;;  %342 = vst [vmem:[%s328_s11] sm:$0xff] %v341_v38  ;;  %346 = vst [vmem:[%s328_s11 + $0x10] sm:$0xff] %v345_v40 }
  0xfd   : > { %v349_v42 = vld [vmem:[%s160_s7 + $0x20] sm:$0xff]  ;;  %344 = vst [vmem:[%s328_s11 + $0x8] sm:$0xff] %v343_v39  ;;  %348 = vst [vmem:[%s328_s11 + $0x18] sm:$0xff] %v347_v41  ;;  %v353_v44 = vld [vmem:[%s160_s7 + $0x30] sm:$0xff] }
  0xfe   : > { %v351_v43 = vld [vmem:[%s160_s7 + $0x28] sm:$0xff]  ;;  %350 = vst [vmem:[%s328_s11 + $0x40] sm:$0xff] %v349_v42  ;;  %v355_v45 = vld [vmem:[%s160_s7 + $0x38] sm:$0xff]  ;;  %354 = vst [vmem:[%s328_s11 + $0x50] sm:$0xff] %v353_v44 }
  0xff   : > { %352 = vst [vmem:[%s328_s11 + $0x48] sm:$0xff] %v351_v43  ;;  %356 = vst [vmem:[%s328_s11 + $0x58] sm:$0xff] %v355_v45 }
 0x100 PF: > { %p10_p8 = scmp.ge.s32.totalorder %s524_s16, 4   ;;  %s573_s12 = smov %s482_s13 }
 0x101   : > { %s574_s13 = smov %s532_s19  ;;  %s575_s14 = smov %s524_s16 }
 0x102   :  { %12 = sbr.rel (!%p10_p8) target bundleno = 2 (0x2), region = 85 }

// kernel: tsegnet_forward.7
= control target key start
LH: loop header
LB: loop body
LE: loop exit
PB: predicated region body
PF: predicated region fallthrough
CT: control target
= control target key end

     0   :  { %vm61_vm0 = vcmask 130048   ;;  %v149_v1 = vmov 0   ;;  %s205_s0 = inlined_call_operand.vmem [shape: bf16[16,128], index: 0, kind: input, shape index: {}]   ;;  %s206_s1 = inlined_call_operand.vmem [shape: bf16[32,16], index: 1, kind: input, shape index: {}]   ;;  %s207_s2 = inlined_call_operand.vmem [shape: f32[32,1], index: 2, kind: input, shape index: {}]   ;;  %s208_s3 = inlined_call_operand.vmem [shape: f32[32,128], index: 3, kind: output, shape index: {}]  }
   0x1   :  { %v146_v0 = vld [vmem:[%s205_s0] sm:$0xff]   ;;  %145 = vset.pattern.permute.xlu1 %v149_v1  ;;  %144 = vset.pattern.permute.xlu0 %v149_v1  ;;  %v148_v3 = vld [vmem:[%s206_s1 + $0x8] sm:$0xff]   ;;  %v23_v4 = vld [vmem:[%s207_s2 + $0x10] sm:$0xff] }
   0x2   :  { %v147_v2 = vld [vmem:[%s206_s1] sm:$0xff]   ;;  %137 = vmatprep.subr.bf16.mxu0 %v146_v0  ;;  %37 = vperm.xlu1 %145, %v23_v4   ;;  %v24_v6 = vld [vmem:[%s207_s2 + $0x18] sm:$0xff]  ;;  %v22_v7 = vld [vmem:[%s207_s2 + $0x8] sm:$0xff] }
   0x3   :  { %138 = vmatpush3.bf16.msra.mxu0 %v146_v0  ;;  %139 = vmatprep.mubr.msk.bf16.mxu0 %vm61_vm0, %v147_v2  ;;  %v21_v5 = vld [vmem:[%s207_s2] sm:$0xff] }
   0x4   :  { %27 = vperm.xlu0 %144, %v21_v5  }
   0x6   :  { %140 = vmatmul.mubr.msk.bf16.vlgmr.msra.gmra.mrb[0].mxu0 %vm61_vm0, %v148_v3  ;;  %42 = vperm.xlu1 %145, %v24_v6  }
   0x8   :  { %32 = vperm.xlu0 %144, %v22_v7  }
  0x81   :  { %v38_v8 = vpop.permute.xlu1 %37 }
  0x83   :  { %v28_v9 = vpop.permute.xlu0 %27 }
  0x85   :  { %v43_v13 = vpop.permute.xlu1 %42 }
  0x87   :  { %v33_v16 = vpop.permute.xlu0 %32 }
  0xd9   :  { %v141_v10 = vpop.f32.mrb[0].mxu0 }
  0xda   :  { %v111_v11 = vadd.f32 %v141_v10, %v38_v8  ;;  %v102_v12 = vpop.f32.mrb[1].mxu0 }
  0xdb   :  { %v103_v14 = vadd.f32 %v102_v12, %v28_v9  ;;  %v142_v15 = vpop.f32.mrb[2].mxu0 }
  0xdc   :  { %v119_v17 = vmax.f32 %v111_v11, 0.0  ;;  %v114_v18 = vadd.f32 %v142_v15, %v43_v13  ;;  %v105_v19 = vpop.f32.mrb[3].mxu0 }
  0xdd   :  { %v117_v20 = vmax.f32 %v103_v14, 0.0  ;;  %v106_v21 = vadd.f32 %v105_v19, %v33_v16 }
  0xde   :  { %123 = vst [vmem:[%s208_s3 + $0x10] sm:$0xff] %v119_v17  ;;  %v120_v22 = vmax.f32 %v114_v18, 0.0 }
  0xdf   :  { %121 = vst [vmem:[%s208_s3] sm:$0xff] %v117_v20  ;;  %v118_v23 = vmax.f32 %v106_v21, 0.0 }
  0xe0   :  { %124 = vst [vmem:[%s208_s3 + $0x18] sm:$0xff] %v120_v22 }
  0xe1   :  { %122 = vst [vmem:[%s208_s3 + $0x8] sm:$0xff] %v118_v23 }

// kernel: tsegnet_forward.8
= control target key start
LH: loop header
LB: loop body
LE: loop exit
PB: predicated region body
PF: predicated region fallthrough
CT: control target
= control target key end

     0   :  { %v125_v0 = vmov 0.0   ;;  %vm126_vm0 = vmmov 0   ;;  %v127_v2 = vmov 0   ;;  %vm38_vm1 = vcmask 261120   ;;  %s163_s0 = inlined_call_operand.vmem [shape: bf16[32,128], index: 0, kind: input, shape index: {}]   ;;  %s164_s2 = inlined_call_operand.vmem [shape: f32[4,1], index: 2, kind: input, shape index: {}]   ;;  %s165_s1 = inlined_call_operand.vmem [shape: bf16[4,32], index: 1, kind: input, shape index: {}]   ;;  %s166_s3 = inlined_call_operand.vmem [shape: f32[4,128], index: 3, kind: output, shape index: {}]  }
   0x1   :  { %105 = vmatprep.subr.bf16.mxu0 %v125_v0  ;;  %v117_v1 = vld [vmem:[%s163_s0] sm:$0xff]   ;;  %109 = vmatprep.mubr.msk.bf16.mxu0 %vm126_vm0, %v125_v0  ;;  %v118_v3 = vld [vmem:[%s163_s0 + $0x8] sm:$0xff]   ;;  %v82_v15 = vlaneseq }
   0x2   :  { %116 = vset.pattern.permute.xlu0 %v127_v2  ;;  %106 = vmatpush3.bf16.msra.mxu0 %v117_v1  ;;  %v20_v4 = vld [vmem:[%s164_s2] sm:$0xf] }
   0x3   :  { %107 = vmatprep.subr.bf16.mxu0 %v125_v0  ;;  %23 = vperm.xlu0 %116, %v20_v4   ;;  %v15_v5 = vld [vmem:[%s165_s1] sm:$0x3]  ;;  %v83_v16 = vshrl.u32 %v82_v15, 7 }
   0x5   :  { %vm84_vm2 = vcmp.lt.s32.totalorder %v83_v16, 3 }
   0x6   :  { %108 = vmatpush3.bf16.msra.mxu0 %v118_v3 }
   0x9   :  { %110 = vmatmul.mubr.msk.bf16.vlgmr.msra.gmra.mrb[0].mxu0 %vm38_vm1, %v15_v5 }
  0x82   :  { %v24_v6 = vpop.permute.xlu0 %23 }
  0xdc   :  { %v76_v7 = vpop.f32.mrb[0].mxu0 }
  0xdd   :  { %v77_v8 = vadd.f32 %v76_v7, %v24_v6  ;;  %v111_v9 = vpop.f32.mrb[1].mxu0 }
  0xde   :  { %v79_v10 = vpop.f32.mrb[2].mxu0 }
  0xdf   :  { %v101_v11 = vmul.f32 -1.442695, %v77_v8  ;;  %v112_v12 = vpop.f32.mrb[3].mxu0 }
  0xe1   :  { %119 = vpow2.f32 %v101_v11 }
  0xe2   :  { %121 = vtanh.f32 %v77_v8 }
  0xeb   :  { %v120_v13 = vpop.eup %119 }
  0xec   :  { %v89_v14 = vadd.f32 1.0, %v120_v13  ;;  %v122_v17 = vpop.eup %121 }
  0xee   :  { %123 = vrcp.f32 %v89_v14 }
  0xf8   :  { %v124_v18 = vpop.eup %123 }
  0xf9   :  { %v92_v19 = vsel %vm84_vm2, %v122_v17, %v124_v18 }
  0xfa   :  { %93 = vst [vmem:[%s166_s3] sm:$0xf] %v92_v19 }

// kernel: neg.4
= control target key start
LH: loop header
LB: loop body
LE: loop exit
PB: predicated region body
PF: predicated region fallthrough
CT: control target
= control target key end

     0   :  { %s136_s0 = inlined_call_operand.vmem [shape: f32[8,1024], index: 0, kind: input, shape index: {}]   ;;  %s137_s1 = inlined_call_operand.vmem [shape: f32[8,1024], index: 1, kind: output, shape index: {}]  }
   0x1   :  { %v2_v0 = vld [vmem:[%s136_s0] sm:$0xff]  ;;  %v64_v1 = vld [vmem:[%s136_s0 + $0x8] sm:$0xff]  ;;  %v66_v2 = vld [vmem:[%s136_s0 + $0x10] sm:$0xff] }
   0x2   :  { %v5_v3 = vxor.u32 2147483648, %v2_v0  ;;  %v12_v4 = vxor.u32 2147483648, %v64_v1  ;;  %v20_v5 = vxor.u32 2147483648, %v66_v2  ;;  %v68_v6 = vld [vmem:[%s136_s0 + $0x18] sm:$0xff]  ;;  %v70_v7 = vld [vmem:[%s136_s0 + $0x20] sm:$0xff]  ;;  %v72_v8 = vld [vmem:[%s136_s0 + $0x28] sm:$0xff] }
   0x3   :  { %v28_v9 = vxor.u32 2147483648, %v68_v6  ;;  %v36_v10 = vxor.u32 2147483648, %v70_v7  ;;  %v44_v11 = vxor.u32 2147483648, %v72_v8  ;;  %v74_v12 = vld [vmem:[%s136_s0 + $0x30] sm:$0xff]  ;;  %v76_v13 = vld [vmem:[%s136_s0 + $0x38] sm:$0xff] }
   0x4   :  { %7 = vst [vmem:[%s137_s1] sm:$0xff] %v5_v3  ;;  %65 = vst [vmem:[%s137_s1 + $0x8] sm:$0xff] %v12_v4  ;;  %v52_v14 = vxor.u32 2147483648, %v74_v12  ;;  %v60_v15 = vxor.u32 2147483648, %v76_v13 }
   0x5   :  { %67 = vst [vmem:[%s137_s1 + $0x10] sm:$0xff] %v20_v5  ;;  %69 = vst [vmem:[%s137_s1 + $0x18] sm:$0xff] %v28_v9 }
   0x6   :  { %71 = vst [vmem:[%s137_s1 + $0x20] sm:$0xff] %v36_v10  ;;  %73 = vst [vmem:[%s137_s1 + $0x28] sm:$0xff] %v44_v11 }
   0x7   :  { %75 = vst [vmem:[%s137_s1 + $0x30] sm:$0xff] %v52_v14  ;;  %77 = vst [vmem:[%s137_s1 + $0x38] sm:$0xff] %v60_v15 }

// kernel: tsegnet_forward.9
= control target key start
LH: loop header
LB: loop body
LE: loop exit
PB: predicated region body
PF: predicated region fallthrough
CT: control target
= control target key end

     0   :  { %s417_s9 = smov 0   ;;  %s441_s0 = inlined_call_operand.vmem [shape: f32[8,3], index: 0, kind: input, shape index: {}]   ;;  %s442_s1 = inlined_call_operand.vmem [shape: f32[3,1024], index: 1, kind: input, shape index: {}]   ;;  %s443_s2 = inlined_call_operand.vmem [shape: f32[8,1024], index: 2, kind: output, shape index: {}]  }
   0x1 LB: > { %s365_s10 = sadd.s32 4294967295, %s397_s9   ;;  %p369_p0 = scmp.ge.s32.totalorder %s397_s9, 1  ;;  %s397_s9 = sphi %s417_s9, %s12_s9  }
   0x2   : > { %p113_p1 = scmp.lt.s32.totalorder %s397_s9, 3 }
   0x4   : > { %p114_p2 = pnand %p369_p0, %p113_p1 }
   0x5   : > { %v147_v0 = vld [vmem:[%s441_s0] sm:$0xff] (!%p114_p2)  ;;  %v399_v1 = vmov (!%p114_p2), 0   ;;  %v400_v2 = vmov (!%p114_p2), 2   ;;  %v401_v3 = vmov (!%p114_p2), 1   ;;  %s370_s13 = sshll.u32 (!%p114_p2), %s365_s10, 2  ;;  %v157_v4 = vlaneseq (!%p114_p2) }
   0x6   : > { %117 = sbr.rel (%p114_p2) target bundleno = 150 (0x96), region = 28  ;;  %387 = vset.pattern.permute.xlu0 (!%p114_p2), %v399_v1  ;;  %389 = vset.pattern.permute.xlu1 (!%p114_p2), %v400_v2  ;;  %p136_p3 = scmp.lt.s32.totalorder (!%p114_p2), %s370_s13, 7 }
   0x7   : > { %152 = vperm.xlu0 (!%p114_p2), %387, %v147_v0   ;;  %242 = vperm.xlu1 (!%p114_p2), %389, %v147_v0   ;;  %v158_v5 = vshrl.u32 (!%p114_p2), %v157_v4, 7 }
   0x9   : > { %v159_v6 = vsub.s32 (!%p114_p2), 0, %v158_v5  ;;  %v163_v8 = vsub.s32 (!%p114_p2), 4, %v158_v5  ;;  %v247_v9 = vsub.s32 (!%p114_p2), 2, %v158_v5  ;;  %v251_v10 = vsub.s32 (!%p114_p2), 6, %v158_v5 }
   0xa   : > { %v203_v13 = vsub.s32 (!%p114_p2), 1, %v158_v5  ;;  %v207_v14 = vsub.s32 (!%p114_p2), 5, %v158_v5 }
   0xb   : > { %388 = vset.pattern.permute.xlu0 (!%p114_p2), %v401_v3 }
   0xc   : > { %198 = vperm.xlu0 (!%p114_p2), %388, %v147_v0  }
   0xd   : > { %s445_s13 = smov (!%p136_p3, %s370_s13), 7 }
   0xe   : > { %s371_s14 = sshll.u32 %s445_s13, 2  ;;  %s373_s18 = sshll.u32 %s445_s13, 3 }
   0xf   : > { %s139_s17 = scalar_lea.vmem %s442_s1, %s371_s14  ;;  %s145_s21 = scalar_lea.vmem %s443_s2, %s373_s18 }
  0x10   : > { %390 = vset.pattern.permute.xlu0 %v400_v2  ;;  %v148_v7 = vld [vmem:[%s139_s17] sm:$0x77]  ;;  %v149_v11 = vld [vmem:[%s139_s17 + $0x8] sm:$0x77] }
  0x11   : > { %v160_v12 = vrot.slane %v148_v7, %v159_v6  ;;  %v164_v15 = vrot.slane %v148_v7, %v163_v8  ;;  %v168_v16 = vrot.slane %v149_v11, %v159_v6  ;;  %v248_v17 = vrot.slane %v148_v7, %v247_v9 }
  0x12   : > { %v252_v18 = vrot.slane %v148_v7, %v251_v10  ;;  %v172_v19 = vrot.slane %v149_v11, %v163_v8  ;;  %v256_v21 = vrot.slane %v149_v11, %v247_v9  ;;  %v260_v22 = vrot.slane %v149_v11, %v251_v10 }
  0x13   : > { %v180_v20 = vrot.slane %v160_v12, %v159_v6  ;;  %v204_v23 = vrot.slane %v148_v7, %v203_v13  ;;  %v208_v24 = vrot.slane %v148_v7, %v207_v14  ;;  %v212_v25 = vrot.slane %v149_v11, %v203_v13 }
  0x14   : > { %v216_v26 = vrot.slane %v149_v11, %v207_v14  ;;  %v184_v27 = vrot.slane %v164_v15, %v159_v6  ;;  %v188_v28 = vrot.slane %v168_v16, %v159_v6  ;;  %v268_v29 = vrot.slane %v248_v17, %v247_v9 }
  0x15   : > { %v272_v30 = vrot.slane %v252_v18, %v247_v9  ;;  %v192_v33 = vrot.slane %v172_v19, %v159_v6  ;;  %v276_v35 = vrot.slane %v256_v21, %v247_v9  ;;  %v280_v36 = vrot.slane %v260_v22, %v247_v9 }
  0x16   : > { %v224_v37 = vrot.slane %v204_v23, %v203_v13  ;;  %v228_v38 = vrot.slane %v208_v24, %v203_v13  ;;  %v232_v39 = vrot.slane %v212_v25, %v203_v13  ;;  %v236_v40 = vrot.slane %v216_v26, %v203_v13 }
  0x86   : > { %v153_v31 = vpop.permute.xlu0 %152  ;;  %v243_v32 = vpop.permute.xlu1 %242 }
  0x87   : > { %v193_v34 = vsub.f32 %v153_v31, %v180_v20  ;;  %v194_v41 = vsub.f32 %v153_v31, %v184_v27  ;;  %v195_v42 = vsub.f32 %v153_v31, %v188_v28  ;;  %v281_v43 = vsub.f32 %v243_v32, %v268_v29 }
  0x88   : > { %v282_v44 = vsub.f32 %v243_v32, %v272_v30  ;;  %v196_v45 = vsub.f32 %v153_v31, %v192_v33  ;;  %v283_v48 = vsub.f32 %v243_v32, %v276_v35  ;;  %v284_v49 = vsub.f32 %v243_v32, %v280_v36 }
  0x89   : > { %v285_v46 = vmul.f32 %v193_v34, %v193_v34  ;;  %v286_v54 = vmul.f32 %v194_v41, %v194_v41  ;;  %v287_v55 = vmul.f32 %v195_v42, %v195_v42  ;;  %v297_v56 = vmul.f32 %v281_v43, %v281_v43 }
  0x8a   : > { %v298_v57 = vmul.f32 %v282_v44, %v282_v44  ;;  %v288_v62 = vmul.f32 %v196_v45, %v196_v45  ;;  %v299_v2 = vmul.f32 %v283_v48, %v283_v48  ;;  %v300_v4 = vmul.f32 %v284_v49, %v284_v49 }
  0x8b   : > { %v199_v47 = vpop.permute.xlu0 %198 }
  0x8c   : > { %v237_v50 = vsub.f32 %v199_v47, %v224_v37  ;;  %v238_v51 = vsub.f32 %v199_v47, %v228_v38  ;;  %v239_v52 = vsub.f32 %v199_v47, %v232_v39  ;;  %v240_v53 = vsub.f32 %v199_v47, %v236_v40 }
  0x8e   : > { %v289_v58 = vmul.f32 %v237_v50, %v237_v50  ;;  %v290_v59 = vmul.f32 %v238_v51, %v238_v51  ;;  %v291_v60 = vmul.f32 %v239_v52, %v239_v52  ;;  %v292_v61 = vmul.f32 %v240_v53, %v240_v53 }
  0x90   : > { %v293_v63 = vadd.f32 %v289_v58, %v285_v46  ;;  %v294_v0 = vadd.f32 %v290_v59, %v286_v54  ;;  %v295_v1 = vadd.f32 %v291_v60, %v287_v55  ;;  %v296_v3 = vadd.f32 %v292_v61, %v288_v62 }
  0x92   : > { %v301_v5 = vadd.f32 %v297_v56, %v293_v63  ;;  %v302_v6 = vadd.f32 %v298_v57, %v294_v0  ;;  %v303_v7 = vadd.f32 %v299_v2, %v295_v1  ;;  %v304_v8 = vadd.f32 %v300_v4, %v296_v3 }
  0x94   : > { %305 = vst [vmem:[%s145_s21] sm:$0xff] %v301_v5  ;;  %306 = vst [vmem:[%s145_s21 + $0x8] sm:$0xff] %v302_v6 }
  0x95   : > { %307 = vst [vmem:[%s145_s21 + $0x10] sm:$0xff] %v303_v7  ;;  %308 = vst [vmem:[%s145_s21 + $0x18] sm:$0xff] %v304_v8 }
  0x96 PF: > { %s12_s9 = sadd.s32 1, %s397_s9  }
  0x97   : > { %p9_p4 = scmp.ge.s32.totalorder %s12_s9, 4  }
  0x99   :  { %11 = sbr.rel (!%p9_p4) target bundleno = 1 (0x1), region = 58 }

// kernel: tsegnet_forward.10
= control target key start
LH: loop header
LB: loop body
LE: loop exit
PB: predicated region body
PF: predicated region fallthrough
CT: control target
= control target key end

     0   :  { %s511_s12 = smov 0   ;;  %s513_s13 = smov 0   ;;  %s568_s0 = inlined_call_operand.vmem [shape: bf16[8,20,128], index: 0, kind: input, shape index: {}]   ;;  %s569_s1 = inlined_call_operand.vmem [shape: bf16[32,20], index: 1, kind: input, shape index: {}]   ;;  %s570_s2 = inlined_call_operand.vmem [shape: f32[32,1], index: 2, kind: input, shape index: {}]   ;;  %s571_s3 = inlined_call_operand.vmem [shape: f32[8,32,128], index: 3, kind: output, shape index: {}]  }
   0x1   :  { %s515_s14 = smov 0  }
   0x2 LB: > { %s25_s15 = sadd.s32 1, %s484_s13  ;;  %p408_p0 = scmp.ge.s32.totalorder %s488_s14, 1  ;;  %s488_s14 = sphi %s515_s14, %s13_s14   ;;  %s484_s13 = sphi %s513_s13, %s573_s13   ;;  %s480_s12 = sphi %s511_s12, %s572_s12  }
   0x3   : > { %p27_p1 = scmp.ge.s32.totalorder %s25_s15, 8  ;;  %p156_p2 = scmp.lt.s32.totalorder %s488_s14, 9 }
   0x5   : > { %s575_s15 = smov (%p27_p1, %s25_s15), 0  ;;  %p157_p3 = pnand %p408_p0, %p156_p2 }
   0x6   : > { %p186_p4 = scmp.lt.s32.totalorder (!%p157_p3), %s480_s12, 7  ;;  %v464_v0 = vld [vmem:[%s569_s1] sm:$0xff] (!%p157_p3)   ;;  %vm253_vm0 = vcmask (!%p157_p3), 162816   ;;  %v212_v1 = vld [vmem:[%s570_s2 + $0x10] sm:$0xff] (!%p157_p3)  ;;  %v490_v3 = vmov (!%p157_p3), 0   ;;  %v213_v4 = vld [vmem:[%s570_s2 + $0x18] sm:$0xff] (!%p157_p3) }
   0x7   : > { %160 = sbr.rel (%p157_p3) target bundleno = 247 (0xf7), region = 32  ;;  %v210_v2 = vld [vmem:[%s570_s2] sm:$0xff] (!%p157_p3)  ;;  %429 = vmatprep.mubr.msk.bf16.mxu0 (!%p157_p3), %vm253_vm0, %v464_v0  ;;  %461 = vset.pattern.permute.xlu1 (!%p157_p3), %v490_v3  ;;  %v211_v5 = vld [vmem:[%s570_s2 + $0x8] sm:$0xff] (!%p157_p3)  ;;  %vm260_vm1 = vcmask (!%p157_p3), 1041408  }
   0x8   : > { %460 = vset.pattern.permute.xlu0 (!%p157_p3), %v490_v3  ;;  %226 = vperm.xlu1 (!%p157_p3), %461, %v212_v1   ;;  %v465_v9 = vld [vmem:[%s569_s1 + $0x8] sm:$0xff] (!%p157_p3)  }
   0x9   : > { %216 = vperm.xlu0 (!%p157_p3), %460, %v210_v2  }
   0xc   : > { %231 = vperm.xlu1 (!%p157_p3), %461, %v213_v4  }
   0xd   : > { %221 = vperm.xlu0 (!%p157_p3), %460, %v211_v5  }
   0xe   : > { %s577_s12 = smov (!%p186_p4, %s480_s12), 7 }
   0xf   : > { %s434_s22 = smul.u32 12, %s577_s12  ;;  %s420_s5 = sshll.u32 %s577_s12, 5 }
  0x10   : > { %s201_s8 = scalar_lea.vmem %s571_s3, %s420_s5 }
  0x11   : > { %s193_s27 = scalar_lea.vmem %s568_s0, %s434_s22 }
  0x12   : > { %v462_v6 = vld [vmem:[%s193_s27] sm:$0xff]   ;;  %v463_v7 = vld [vmem:[%s193_s27 + $0x8] ss:$0 sps:$4 sm:$0x33]  }
  0x13   : > { %425 = vmatprep.subr.bf16.mxu0 %v462_v6  ;;  %v262_v8 = vsel %vm260_vm1, %v463_v7, 0 }
  0x14   : > { %426 = vmatpush3.bf16.msra.mxu0 %v462_v6 }
  0x15   : > { %433 = vmatprep.subr.msk.bf16.mxu0 %vm260_vm1, %v463_v7 }
  0x18   : > { %428 = vmatpush3.bf16.msra.mxu0 %v262_v8 }
  0x1b   : > { %430 = vmatmul.mubr.msk.bf16.vlgmr.msra.gmra.mrb[0].mxu0 %vm253_vm0, %v465_v9 }
  0x87   : > { %v227_v10 = vpop.permute.xlu1 %226 }
  0x88   : > { %v217_v11 = vpop.permute.xlu0 %216 }
  0x8b   : > { %v232_v15 = vpop.permute.xlu1 %231 }
  0x8c   : > { %v222_v18 = vpop.permute.xlu0 %221 }
  0xee   : > { %v431_v12 = vpop.f32.mrb[0].mxu0 }
  0xef   : > { %v307_v13 = vadd.f32 %v431_v12, %v227_v10  ;;  %v298_v14 = vpop.f32.mrb[1].mxu0 }
  0xf0   : > { %v299_v16 = vadd.f32 %v298_v14, %v217_v11  ;;  %v432_v17 = vpop.f32.mrb[2].mxu0 }
  0xf1   : > { %v315_v19 = vmax.f32 %v307_v13, 0.0  ;;  %v310_v20 = vadd.f32 %v432_v17, %v232_v15  ;;  %v301_v21 = vpop.f32.mrb[3].mxu0 }
  0xf2   : > { %v313_v22 = vmax.f32 %v299_v16, 0.0  ;;  %v302_v23 = vadd.f32 %v301_v21, %v222_v18 }
  0xf3   : > { %319 = vst [vmem:[%s201_s8 + $0x10] sm:$0xff] %v315_v19  ;;  %v316_v24 = vmax.f32 %v310_v20, 0.0 }
  0xf4   : > { %317 = vst [vmem:[%s201_s8] sm:$0xff] %v313_v22  ;;  %v314_v25 = vmax.f32 %v302_v23, 0.0 }
  0xf5   : > { %320 = vst [vmem:[%s201_s8 + $0x18] sm:$0xff] %v316_v24 }
  0xf6   : > { %318 = vst [vmem:[%s201_s8 + $0x8] sm:$0xff] %v314_v25 }
  0xf7 PF: > { %s13_s14 = sadd.s32 1, %s488_s14   ;;  %s572_s12 = smov %s484_s13 }
  0xf8   : > { %p10_p5 = scmp.ge.s32.totalorder %s13_s14, 10   ;;  %s573_s13 = smov %s575_s15 }
  0xfa   :  { %12 = sbr.rel (!%p10_p5) target bundleno = 2 (0x2), region = 62 }

// kernel: tsegnet_forward.11
= control target key start
LH: loop header
LB: loop body
LE: loop exit
PB: predicated region body
PF: predicated region fallthrough
CT: control target
= control target key end

     0   :  { %s463_s12 = smov 0   ;;  %s465_s13 = smov 0   ;;  %s506_s0 = inlined_call_operand.vmem [shape: bf16[8,32,128], index: 0, kind: input, shape index: {}]   ;;  %s507_s1 = inlined_call_operand.vmem [shape: bf16[5,32], index: 1, kind: input, shape index: {}]   ;;  %s508_s2 = inlined_call_operand.vmem [shape: f32[5,1], index: 2, kind: input, shape index: {}]   ;;  %s509_s3 = inlined_call_operand.vmem [shape: f32[8,5,128], index: 3, kind: output, shape index: {}]  }
   0x1   :  { %s467_s14 = smov 0  }
   0x2 LB: > { %s25_s15 = sadd.s32 1, %s434_s13  ;;  %p360_p0 = scmp.ge.s32.totalorder %s438_s14, 1  ;;  %s438_s14 = sphi %s467_s14, %s13_s14   ;;  %s434_s13 = sphi %s465_s13, %s511_s13   ;;  %s430_s12 = sphi %s463_s12, %s510_s12  }
   0x3   : > { %p27_p1 = scmp.ge.s32.totalorder %s25_s15, 8  ;;  %p156_p2 = scmp.lt.s32.totalorder %s438_s14, 9 }
   0x5   : > { %s513_s15 = smov (%p27_p1, %s25_s15), 0  ;;  %p157_p3 = pnand %p360_p0, %p156_p2 }
   0x6   : > { %p185_p4 = scmp.lt.s32.totalorder (!%p157_p3), %s430_s12, 7  ;;  %v440_v0 = vmov (!%p157_p3), 0.0   ;;  %vm441_vm0 = vmmov (!%p157_p3), 0   ;;  %v206_v1 = vld [vmem:[%s508_s2] sm:$0x1f] (!%p157_p3)  ;;  %v442_v2 = vmov (!%p157_p3), 0   ;;  %v268_v15 = vlaneseq (!%p157_p3) }
   0x7   : > { %160 = sbr.rel (%p157_p3) target bundleno = 267 (0x10b), region = 32  ;;  %374 = vmatprep.subr.bf16.mxu0 (!%p157_p3), %v440_v0  ;;  %378 = vmatprep.mubr.msk.bf16.mxu0 (!%p157_p3), %vm441_vm0, %v440_v0  ;;  %v201_v5 = vld [vmem:[%s507_s1] sm:$0x7] (!%p157_p3)  ;;  %vm224_vm1 = vcmask (!%p157_p3), 261120  }
   0x8   : > { %409 = vset.pattern.permute.xlu0 (!%p157_p3), %v442_v2  ;;  %v269_v16 = vshrl.u32 (!%p157_p3), %v268_v15, 7 }
   0x9   : > { %209 = vperm.xlu0 (!%p157_p3), %409, %v206_v1  }
   0xa   : > { %vm270_vm2 = vcmp.eq.s32.totalorder (!%p157_p3), %v269_v16, 2 }
   0xe   : > { %s515_s12 = smov (!%p185_p4, %s430_s12), 7 }
   0xf   : > { %s370_s18 = sshll.u32 %s515_s12, 4  ;;  %s363_s24 = sshll.u32 %s515_s12, 3 }
  0x10   : > { %s192_s21 = scalar_lea.vmem %s506_s0, %s370_s18  ;;  %s199_s27 = scalar_lea.vmem %s509_s3, %s363_s24 }
  0x11   : > { %v410_v3 = vld [vmem:[%s192_s21] sm:$0xff]   ;;  %v411_v4 = vld [vmem:[%s192_s21 + $0x8] sm:$0xff]  }
  0x12   : > { %375 = vmatpush3.bf16.msra.mxu0 %v410_v3 }
  0x13   : > { %376 = vmatprep.subr.bf16.mxu0 %v440_v0 }
  0x16   : > { %377 = vmatpush3.bf16.msra.mxu0 %v411_v4 }
  0x19   : > { %379 = vmatmul.mubr.msk.bf16.vlgmr.msra.gmra.mrb[0].mxu0 %vm224_vm1, %v201_v5 }
  0x88   : > { %v210_v6 = vpop.permute.xlu0 %209 }
  0xec   : > { %v262_v7 = vpop.f32.mrb[0].mxu0 }
  0xed   : > { %v263_v8 = vadd.f32 %v262_v7, %v210_v6  ;;  %v380_v9 = vpop.f32.mrb[1].mxu0 }
  0xee   : > { %v265_v10 = vpop.f32.mrb[2].mxu0 }
  0xef   : > { %v367_v11 = vmul.f32 -1.442695, %v263_v8  ;;  %v381_v12 = vpop.f32.mrb[3].mxu0 }
  0xf1   : > { %412 = vpow2.f32 %v367_v11 }
  0xfb   : > { %v413_v13 = vpop.eup %412 }
  0xfc   : > { %v274_v14 = vadd.f32 1.0, %v413_v13 }
  0xfe   : > { %414 = vrcp.f32 %v274_v14 }
 0x108   : > { %v415_v17 = vpop.eup %414 }
 0x109   : > { %v277_v18 = vsel %vm270_vm2, %v415_v17, %v263_v8 }
 0x10a   : > { %278 = vst [vmem:[%s199_s27] sm:$0x1f] %v277_v18 }
 0x10b PF: > { %s13_s14 = sadd.s32 1, %s438_s14   ;;  %s510_s12 = smov %s434_s13 }
 0x10c   : > { %p10_p5 = scmp.ge.s32.totalorder %s13_s14, 10   ;;  %s511_s13 = smov %s513_s15 }
 0x10e   :  { %12 = sbr.rel (!%p10_p5) target bundleno = 2 (0x2), region = 62 }

</bundles_post_ra>
